<compile_context>
chip_gen: v6e
topology: v6e:2x2x1
jax: 0.10.0
libtpu: 0.0.40
codegen_flags: <defaults>
</compile_context>

<pallas_src>
import jax
import jax.numpy as jnp
from jax.experimental import pallas as pl
from jax.experimental.pallas import tpu as pltpu


def linear_kernel(x_ref, w_ref, b_ref, o_ref):
    # x_ref: (TM, n_attrs) VMEM batch tile
    # w_ref: (1, n_attrs)  VMEM weight row (resident across all tiles)
    # b_ref: (1,)          SMEM scalar bias
    # o_ref: (1, TM)       VMEM lane-dense output block
    prod = x_ref[...] * w_ref[...]            # VPU broadcast multiply
    row_sum = jnp.sum(prod, axis=-1)          # XLU lane reduce -> (TM,)
    o_ref[...] = (row_sum + b_ref[0])[None, :].astype(o_ref.dtype)


def _round_up(x, m):
    return ((x + m - 1) // m) * m


def mlp_forward(x, weight, bias, *, block_rows=512):
    """y = x @ weight.T + bias, matching torch.nn.Linear(n_attrs, 1).

    x: [B, n_attrs] f32; weight: [1, n_attrs] f32 (PyTorch layout); bias: [1] f32.
    Returns [B, 1] f32.
    """
    B, n_attrs = x.shape
    assert weight.shape == (1, n_attrs)
    assert bias.shape == (1,)
    assert block_rows % 128 == 0

    # Batch tile: multiple of 128 so the lane-dense output block is aligned.
    # 512 rows amortizes per-step overhead; (512, 32) f32 double-buffered is
    # well under the scoped-VMEM limit on v5e/v6e/v7x.
    tm = min(block_rows, _round_up(B, 128))
    g = pl.cdiv(B, tm)
    b_pad = g * tm
    if b_pad != B:
        # Pad rows with zeros; padded outputs are sliced off below.
        x = jnp.pad(x, ((0, b_pad - B), (0, 0)))

    out_slab = pl.pallas_call(
        linear_kernel,
        out_shape=jax.ShapeDtypeStruct((1, b_pad), x.dtype),
        grid_spec=pltpu.PrefetchScalarGridSpec(
            num_scalar_prefetch=0,
            grid=(g,),
            in_specs=[
                pl.BlockSpec((tm, n_attrs), lambda i: (i, 0)),        # x tile
                pl.BlockSpec((1, n_attrs), lambda i: (0, 0)),         # weight
                pl.BlockSpec(memory_space=pltpu.MemorySpace.SMEM),    # bias scalar
            ],
            out_specs=pl.BlockSpec((1, tm), lambda i: (0, i)),        # lane-dense
        ),
        compiler_params=pltpu.CompilerParams(
            dimension_semantics=("parallel",)),
    )(x, weight, bias)

    return out_slab[0, :B].reshape(B, 1)


if __name__ == "__main__":
    n_attrs = 32
    batch = 8

    key = jax.random.PRNGKey(0)
    kx, kw, kb = jax.random.split(key, 3)

    # Deterministic inputs, same shapes as torch.nn.Linear(n_attrs, 1).
    x = jax.random.normal(kx, (batch, n_attrs), dtype=jnp.float32)
    weight = jax.random.normal(kw, (1, n_attrs), dtype=jnp.float32) * 0.1
    bias = jax.random.normal(kb, (1,), dtype=jnp.float32) * 0.1

    out = mlp_forward(x, weight, bias)
    jax.block_until_ready(out)

    # Pure-JAX reference check.
    ref = x @ weight.T + bias
    assert out.shape == (batch, 1)
    assert jnp.allclose(out, ref, atol=1e-5, rtol=1e-5)

    print("KERNEL_OK")
</pallas_src>

<mosaic_0001>
module attributes {stable_mosaic.version = 11 : i64} {
  func.func @linear_kernel(%arg0: i32, %arg1: memref<128x32xf32, #tpu.memory_space<vmem>>, %arg2: memref<1x32xf32, #tpu.memory_space<vmem>>, %arg3: memref<1xf32, #tpu.memory_space<smem>>, %arg4: memref<1x128xf32, #tpu.memory_space<vmem>>) attributes {dimension_semantics = [#tpu.dimension_semantics<parallel>], iteration_bounds = array<i64: 1>, scalar_prefetch = 0 : i64, scratch_operands = 0 : i64, tpu.core_type = #tpu.core_type<tc>, window_params = [{transform_indices = @transform_0, window_bounds = array<i64: 128, 32>}, {pipeline_mode = #tpu.pipeline_mode<synchronous>, transform_indices = @transform_1, window_bounds = array<i64: 1, 32>}, {transform_indices = @transform_2, window_bounds = array<i64: 1>}, {transform_indices = @transform_3, window_bounds = array<i64: 1, 128>}]} {
    %c0 = arith.constant 0 : index
    %c0_0 = arith.constant 0 : index
    %0 = vector.load %arg1[%c0, %c0_0] : memref<128x32xf32, #tpu.memory_space<vmem>>, vector<128x32xf32>
    %c0_1 = arith.constant 0 : index
    %c0_2 = arith.constant 0 : index
    %1 = vector.load %arg2[%c0_1, %c0_2] : memref<1x32xf32, #tpu.memory_space<vmem>>, vector<1x32xf32>
    %2 = vector.broadcast %1 : vector<1x32xf32> to vector<128x32xf32>
    %3 = arith.mulf %0, %2 : vector<128x32xf32>
    %cst = arith.constant dense<0.000000e+00> : vector<128xf32>
    %4 = vector.multi_reduction <add>, %3, %cst [1] : vector<128x32xf32> to vector<128xf32>
    %c0_3 = arith.constant 0 : index
    %5 = memref.load %arg3[%c0_3] : memref<1xf32, #tpu.memory_space<smem>>
    %6 = vector.broadcast %5 : f32 to vector<128xf32>
    %7 = arith.addf %4, %6 : vector<128xf32>
    %8 = vector.shape_cast %7 : vector<128xf32> to vector<1x128xf32>
    %c0_4 = arith.constant 0 : index
    %c0_5 = arith.constant 0 : index
    %9 = vector.load %arg4[%c0_4, %c0_5] : memref<1x128xf32, #tpu.memory_space<vmem>>, vector<1x128xf32>
    tpu.vector_store %arg4[%c0_4, %c0_5], %8 {strides = array<i32>} : memref<1x128xf32, #tpu.memory_space<vmem>>, vector<1x128xf32>,
    return
  }
  func.func @transform_0(%arg0: i32) -> (i32, i32) {
    %c0_i32 = arith.constant 0 : i32
    %c0_i32_0 = arith.constant 0 : i32
    return %arg0, %c0_i32 : i32, i32
  }
  func.func @transform_1(%arg0: i32) -> (i32, i32) {
    %c0_i32 = arith.constant 0 : i32
    %c0_i32_0 = arith.constant 0 : i32
    %c0_i32_1 = arith.constant 0 : i32
    return %c0_i32, %c0_i32_0 : i32, i32
  }
  func.func @transform_2(%arg0: i32) -> i32 {
    %c0_i32 = arith.constant 0 : i32
    %c0_i32_0 = arith.constant 0 : i32
    return %c0_i32 : i32
  }
  func.func @transform_3(%arg0: i32) -> (i32, i32) {
    %c0_i32 = arith.constant 0 : i32
    %c0_i32_0 = arith.constant 0 : i32
    return %c0_i32, %arg0 : i32, i32
  }
}

</mosaic_0001>

<bundles_post_ra>
// kernel: tpu_custom_call.1
= control target key start
LH: loop header
LB: loop body
LE: loop exit
PB: predicated region body
PF: predicated region fallthrough
CT: control target
= control target key end

     0   :  { %vm55_vm0 = vcmask 261120   ;;  %s437_s0 = inlined_call_operand.vmem [shape: f32[128,32], index: 0, kind: input, shape index: {}]   ;;  %s438_s1 = inlined_call_operand.vmem [shape: f32[1,32], index: 1, kind: input, shape index: {}]   ;;  %s439_s2 = inlined_call_operand.<no memory space> [shape: f32[1], index: 2, kind: input, shape index: {}]   ;;  %s440_s3 = inlined_call_operand.hbm [shape: f32[1,128], index: 3, kind: output, shape index: {}]  }
   0x1   :  { %v16_v0 = vld [vmem:[%s437_s0] sm:$0xff]  ;;  %v18_v2 = vld [vmem:[%s437_s0 + $0x10] sm:$0xff]  ;;  %v17_v5 = vld [vmem:[%s437_s0 + $0x8] sm:$0xff] }
   0x2   :  { %v265_v1 = vld [vmem:[%s438_s1] ss:$0 sm:$0xff]  ;;  %v19_v6 = vld [vmem:[%s437_s0 + $0x18] sm:$0xff]  ;;  %v21_v10 = vld [vmem:[%s437_s0 + $0x28] sm:$0xff] }
   0x3   :  { %v39_v3 = vmul.f32 %v265_v1, %v16_v0  ;;  %v41_v4 = vmul.f32 %v265_v1, %v18_v2  ;;  %v40_v7 = vmul.f32 %v265_v1, %v17_v5  ;;  %v42_v8 = vmul.f32 %v265_v1, %v19_v6  ;;  %v20_v9 = vld [vmem:[%s437_s0 + $0x20] sm:$0xff] }
   0x4   :  { %v43_v15 = vmul.f32 %v265_v1, %v20_v9  ;;  %v44_v16 = vmul.f32 %v265_v1, %v21_v10 }
   0x5   :  { %v56_v11 = vsel %vm55_vm0, %v39_v3, 0.0  ;;  %v62_v12 = vsel %vm55_vm0, %v41_v4, 0.0  ;;  %v59_v13 = vsel %vm55_vm0, %v40_v7, 0.0  ;;  %v65_v14 = vsel %vm55_vm0, %v42_v8, 0.0 }
   0x6   :  { %57 = vadd.xlane.f32.xlu0 %v56_v11  ;;  %63 = vadd.xlane.f32.xlu1 %v62_v12 }
   0x7   :  { %9 = vsyncpa [#allocation4], 0  ;;  %v22_v17 = vld [vmem:[%s437_s0 + $0x30] sm:$0xff]  ;;  %v23_v18 = vld [vmem:[%s437_s0 + $0x38] sm:$0xff]  ;;  %v68_v19 = vsel %vm55_vm0, %v43_v15, 0.0  ;;  %v71_v20 = vsel %vm55_vm0, %v44_v16, 0.0  ;;  %v138_v49 = vlaneseq  ;;  %v386_v54 = vstv %s439_s2 }
   0x8   :  { %v45_v21 = vmul.f32 %v265_v1, %v22_v17  ;;  %v46_v22 = vmul.f32 %v265_v1, %v23_v18  ;;  %v24_v23 = vld [vmem:[%s437_s0 + $0x40] sm:$0xff]  ;;  %v25_v24 = vld [vmem:[%s437_s0 + $0x48] sm:$0xff]  ;;  %v26_v29 = vld [vmem:[%s437_s0 + $0x50] sm:$0xff]  ;;  %vm149_vm1 = vcmask 130112   ;;  %vm156_vm2 = vcmask 195712   ;;  %s289_s2 = smov [#allocation3]  }
   0x9   :  { %v47_v27 = vmul.f32 %v265_v1, %v24_v23  ;;  %v48_v28 = vmul.f32 %v265_v1, %v25_v24  ;;  %v27_v30 = vld [vmem:[%s437_s0 + $0x58] sm:$0xff]  ;;  %v49_v33 = vmul.f32 %v265_v1, %v26_v29  ;;  %v28_v35 = vld [vmem:[%s437_s0 + $0x60] sm:$0xff]  ;;  %v29_v36 = vld [vmem:[%s437_s0 + $0x68] sm:$0xff]  ;;  %v377_v50 = vand.u32 127, %v138_v49  ;;  %s257_s19 = sshll.u32 %s289_s2, 4  ;;  %s258_s19 = int_to_ptr.vmem [resolvable:$true] %s257_s19 }
   0xa   :  { %60 = vadd.xlane.f32.xlu0 %v59_v13  ;;  %66 = vadd.xlane.f32.xlu1 %v65_v14  ;;  %v74_v25 = vsel %vm55_vm0, %v45_v21, 0.0  ;;  %v77_v26 = vsel %vm55_vm0, %v46_v22, 0.0  ;;  %v50_v34 = vmul.f32 %v265_v1, %v27_v30  ;;  %v51_v39 = vmul.f32 %v265_v1, %v28_v35  ;;  %v30_v41 = vld [vmem:[%s437_s0 + $0x70] sm:$0xff]  ;;  %v31_v42 = vld [vmem:[%s437_s0 + $0x78] sm:$0xff]  ;;  %s267_s20 = scalar_lea.vmem %s258_s19, 16  ;;  %s271_s21 = scalar_lea.vmem %s258_s19, 32 }
   0xb   :  { %v80_v31 = vsel %vm55_vm0, %v47_v27, 0.0  ;;  %v83_v32 = vsel %vm55_vm0, %v48_v28, 0.0  ;;  %v86_v37 = vsel %vm55_vm0, %v49_v33, 0.0  ;;  %v52_v40 = vmul.f32 %v265_v1, %v29_v36  ;;  %p268_p0 = scmp.ne.s32.totalorder %s258_s19, %s267_s20  ;;  %p272_p1 = scmp.lt.s32.totalorder %s258_s19, %s258_s19 }
   0xc   :  { %v89_v38 = vsel %vm55_vm0, %v50_v34, 0.0  ;;  %v92_v43 = vsel %vm55_vm0, %v51_v39, 0.0  ;;  %v53_v45 = vmul.f32 %v265_v1, %v30_v41  ;;  %v54_v46 = vmul.f32 %v265_v1, %v31_v42  ;;  %p273_p2 = scmp.lt.s32.totalorder %s271_s21, %s267_s20 }
   0xd   :  { %v95_v44 = vsel %vm55_vm0, %v52_v40, 0.0  ;;  %v379_v51 = vshrl.u32 %v138_v49, 7  ;;  %v144_v52 = vadd.s32 4294967288, %v377_v50  ;;  %v158_v53 = vadd.s32 4294967272, %v377_v50 }
   0xe   :  { %69 = vadd.xlane.f32.xlu0 %v68_v19  ;;  %72 = vadd.xlane.f32.xlu1 %v71_v20  ;;  %v98_v47 = vsel %vm55_vm0, %v53_v45, 0.0  ;;  %v101_v48 = vsel %vm55_vm0, %v54_v46, 0.0  ;;  %v151_v56 = vadd.s32 4294967280, %v377_v50  ;;  %v165_v58 = vadd.s32 4294967264, %v377_v50  ;;  %p274_p3 = por %p273_p2, %p272_p1 }
   0xf   :  { %v142_v59 = vsub.s32 %v377_v50, %v379_v51  ;;  %v147_v61 = vsub.s32 %v144_v52, %v379_v51  ;;  %v161_v62 = vsub.s32 %v158_v53, %v379_v51  ;;  %v172_v3 = vadd.s32 4294967256, %v377_v50 }
  0x10   :  { %v154_v63 = vsub.s32 %v151_v56, %v379_v51  ;;  %v168_v6 = vsub.s32 %v165_v58, %v379_v51  ;;  %v179_v10 = vadd.s32 4294967248, %v377_v50  ;;  %vm163_vm3 = vcmask 261312   ;;  %p275_p4 = pnand %p274_p3, %p268_p0 }
  0x11   :  { %v175_v13 = vsub.s32 %v172_v3, %v379_v51  ;;  %v186_v15 = vadd.s32 4294967240, %v377_v50  ;;  %vm170_vm4 = vcmask 326912   ;;  %v193_v23 = vadd.s32 4294967232, %v377_v50 }
  0x12   :  { %75 = vadd.xlane.f32.xlu0 %v74_v25  ;;  %78 = vadd.xlane.f32.xlu1 %v77_v26  ;;  %v182_v22 = vsub.s32 %v179_v10, %v379_v51  ;;  %v200_v28 = vadd.s32 4294967224, %v377_v50  ;;  %vm177_vm5 = vcmask 392512   ;;  %vm184_vm6 = vcmask 458112  }
  0x13   :  { %v189_v26 = vsub.s32 %v186_v15, %v379_v51  ;;  %v196_v33 = vsub.s32 %v193_v23, %v379_v51  ;;  %v207_v34 = vadd.s32 4294967216, %v377_v50  ;;  %v214_v40 = vadd.s32 4294967208, %v377_v50 }
  0x14   :  { %vm191_vm7 = vcmask 523712   ;;  %vm198_vm8 = vcmask 589312   ;;  %v221_v46 = vadd.s32 4294967200, %v377_v50  ;;  %vm205_vm9 = vcmask 654912  }
  0x15   :  { %v210_v45 = vsub.s32 %v207_v34, %v379_v51  ;;  %v217_v52 = vsub.s32 %v214_v40, %v379_v51  ;;  %vm212_vm10 = vcmask 720512   ;;  %vm219_vm11 = vcmask 786112  }
  0x16   :  { %81 = vadd.xlane.f32.xlu0 %v80_v31  ;;  %84 = vadd.xlane.f32.xlu1 %v83_v32  ;;  %vm226_vm12 = vcmask 851712   ;;  %vm233_vm13 = vcmask 917312   ;;  %vm240_vm14 = vcmask 982912   ;;  %vm247_vm15 = vcmask 1048512  }
  0x1a   :  { %87 = vadd.xlane.f32.xlu0 %v86_v37  ;;  %90 = vadd.xlane.f32.xlu1 %v89_v38  ;;  %v203_v38 = vsub.s32 %v200_v28, %v379_v51 }
  0x1e   :  { %93 = vadd.xlane.f32.xlu0 %v92_v43  ;;  %96 = vadd.xlane.f32.xlu1 %v95_v44 }
  0x22   :  { %99 = vadd.xlane.f32.xlu0 %v98_v47  ;;  %102 = vadd.xlane.f32.xlu1 %v101_v48 }
  0x8f   :  { %v58_v55 = vpop.xlane.xlu0 %57  ;;  %v64_v57 = vpop.xlane.xlu1 %63 }
  0x90   :  { %v106_v60 = vadd.f32 %v386_v54, %v58_v55  ;;  %v108_v0 = vadd.f32 %v386_v54, %v64_v57  ;;  %v228_v55 = vadd.s32 4294967192, %v377_v50 }
  0x92   :  { %v143_v7 = vrot.slane %v106_v60, %v142_v59  ;;  %v155_v11 = vrot.slane %v108_v0, %v154_v63  ;;  %v224_v60 = vsub.s32 %v221_v46, %v379_v51 }
  0x93   :  { %v61_v1 = vpop.xlane.xlu0 %60  ;;  %v67_v2 = vpop.xlane.xlu1 %66 }
  0x94   :  { %v107_v4 = vadd.f32 %v386_v54, %v61_v1  ;;  %v109_v5 = vadd.f32 %v386_v54, %v67_v2  ;;  %v231_v2 = vsub.s32 %v228_v55, %v379_v51 }
  0x96   :  { %v148_v8 = vrot.slane %v107_v4, %v147_v61  ;;  %v162_v9 = vrot.slane %v109_v5, %v161_v62  ;;  %v235_v61 = vadd.s32 4294967184, %v377_v50  ;;  %v242_v62 = vadd.s32 4294967176, %v377_v50 }
  0x97   :  { %v70_v12 = vpop.xlane.xlu0 %69  ;;  %v73_v14 = vpop.xlane.xlu1 %72 }
  0x98   :  { %v150_v16 = vsel %vm149_vm1, %v148_v8, %v143_v7  ;;  %v110_v17 = vadd.f32 %v386_v54, %v70_v12  ;;  %v111_v18 = vadd.f32 %v386_v54, %v73_v14  ;;  %v238_v8 = vsub.s32 %v235_v61, %v379_v51 }
  0x99   :  { %v157_v19 = vsel %vm156_vm2, %v155_v11, %v150_v16 }
  0x9a   :  { %v164_v20 = vsel %vm163_vm3, %v162_v9, %v157_v19  ;;  %v169_v21 = vrot.slane %v110_v17, %v168_v6  ;;  %v176_v24 = vrot.slane %v111_v18, %v175_v13  ;;  %v245_v9 = vsub.s32 %v242_v62, %v379_v51 }
  0x9b   :  { %v76_v25 = vpop.xlane.xlu0 %75  ;;  %v79_v27 = vpop.xlane.xlu1 %78 }
  0x9c   :  { %v171_v29 = vsel %vm170_vm4, %v169_v21, %v164_v20  ;;  %v112_v30 = vadd.f32 %v386_v54, %v76_v25  ;;  %v113_v31 = vadd.f32 %v386_v54, %v79_v27 }
  0x9d   :  { %v178_v35 = vsel %vm177_vm5, %v176_v24, %v171_v29 }
  0x9e   :  { %v183_v32 = vrot.slane %v112_v30, %v182_v22  ;;  %v190_v36 = vrot.slane %v113_v31, %v189_v26 }
  0x9f   :  { %v82_v37 = vpop.xlane.xlu0 %81  ;;  %v85_v39 = vpop.xlane.xlu1 %84 }
  0xa0   :  { %v185_v41 = vsel %vm184_vm6, %v183_v32, %v178_v35  ;;  %v114_v42 = vadd.f32 %v386_v54, %v82_v37  ;;  %v115_v43 = vadd.f32 %v386_v54, %v85_v39 }
  0xa1   :  { %v192_v47 = vsel %vm191_vm7, %v190_v36, %v185_v41 }
  0xa2   :  { %v197_v44 = vrot.slane %v114_v42, %v196_v33  ;;  %v204_v48 = vrot.slane %v115_v43, %v203_v38 }
  0xa3   :  { %v88_v49 = vpop.xlane.xlu0 %87  ;;  %v91_v53 = vpop.xlane.xlu1 %90 }
  0xa4   :  { %v199_v56 = vsel %vm198_vm8, %v197_v44, %v192_v47  ;;  %v116_v57 = vadd.f32 %v386_v54, %v88_v49  ;;  %v117_v58 = vadd.f32 %v386_v54, %v91_v53 }
  0xa5   :  { %v206_v63 = vsel %vm205_vm9, %v204_v48, %v199_v56 }
  0xa6   :  { %v211_v59 = vrot.slane %v116_v57, %v210_v45  ;;  %v218_v0 = vrot.slane %v117_v58, %v217_v52 }
  0xa7   :  { %v94_v1 = vpop.xlane.xlu0 %93  ;;  %v97_v3 = vpop.xlane.xlu1 %96 }
  0xa8   :  { %v213_v4 = vsel %vm212_vm10, %v211_v59, %v206_v63  ;;  %v118_v5 = vadd.f32 %v386_v54, %v94_v1  ;;  %v119_v6 = vadd.f32 %v386_v54, %v97_v3 }
  0xa9   :  { %v220_v10 = vsel %vm219_vm11, %v218_v0, %v213_v4 }
  0xaa   :  { %v225_v7 = vrot.slane %v118_v5, %v224_v60  ;;  %v232_v50 = vrot.slane %v119_v6, %v231_v2 }
  0xab   :  { %v100_v11 = vpop.xlane.xlu0 %99  ;;  %v103_v12 = vpop.xlane.xlu1 %102 }
  0xac   :  { %v227_v13 = vsel %vm226_vm12, %v225_v7, %v220_v10  ;;  %v120_v14 = vadd.f32 %v386_v54, %v100_v11  ;;  %v121_v15 = vadd.f32 %v386_v54, %v103_v12 }
  0xad   :  { %v234_v18 = vsel %vm233_vm13, %v232_v50, %v227_v13 }
  0xae   :  { %v239_v16 = vrot.slane %v120_v14, %v238_v8  ;;  %v246_v17 = vrot.slane %v121_v15, %v245_v9 }
  0xb0   :  { %v241_v19 = vsel %vm240_vm14, %v239_v16, %v234_v18 }
  0xb1   :  { %v248_v51 = vsel %vm247_vm15, %v246_v17, %v241_v19 }
  0xb2   :  { %250 = vst [vmem:[#allocation3] sm:$0x1] %v248_v51 }
  0xb3   :  { %278 = shalt.err (!%p275_p4)
}
  0xb4   :  { %260 = dma.vmem_to_hbm [thread:$0]  %s258_s19, 16, %s440_s3, [#allocation4]  }
  0xb5   :  { %287 = dma.done.wait [#allocation4], 16  }
  0xb6   :  { %288 = vsyncadd [#allocation4], 4294967280 }
  0xb7   :  { %264 = vsyncpa [#allocation4], 1 }

</bundles_post_ra>
